<compile_context>
chip_gen: v7x
topology: tpu7x:2x2x1
jax: 0.10.0
libtpu: 0.0.40
codegen_flags: <defaults>
</compile_context>

<pallas_src>
import functools
import math

import jax
import jax.numpy as jnp
from jax import lax
from jax.experimental import pallas as pl
from jax.experimental.pallas import tpu as pltpu


def _round_up(x, m):
    return ((x + m - 1) // m) * m


def _splatflow_kernel(*refs, mm_dtype, has_mask, out_d):
    if has_mask:
        (x_ref, centers_ref, params_ref, wv_ref, wo_ref, mask_ref,
         out_ref, tok_scratch) = refs
    else:
        (x_ref, centers_ref, params_ref, wv_ref, wo_ref,
         out_ref, tok_scratch) = refs
        mask_ref = None

    bt, S, Dp = x_ref.shape          # batch tile, padded sequence, padded dim
    Kp = centers_ref.shape[0]        # padded number of splats
    M = bt * S                       # folded matmul M dimension
    precise = mm_dtype == jnp.float32

    # x arrives already in matmul dtype; cast up once for the f32 splat math.
    xm_mm = x_ref[...].reshape(M, Dp)                              # (M, Dp)
    xm = xm_mm.astype(jnp.float32)
    x_sq = jnp.sum(xm * xm, axis=-1, keepdims=True)                # (M, 1) f32

    # Gram-matrix distances: ||x||^2 + ||c||^2 - 2 x@c.T.  The x@c.T matmul is
    # kept in f32 (centers resident in f32, K is small) to avoid cancellation.
    xc = lax.dot_general(xm, centers_ref[...],
                         (((1,), (1,)), ((), ())),
                         preferred_element_type=jnp.float32)       # (M, Kp)

    c_sq = params_ref[0:1, :]        # (1, Kp) ||c||^2   (0 for padded splats)
    inv_ss = params_ref[1:2, :]      # (1, Kp) 1/scale^2 (1 for padded)
    amp = params_ref[2:3, :]         # (1, Kp) amplitude (0 for padded)

    dist_sq = jnp.maximum(x_sq + c_sq - 2.0 * xc, 0.0)
    normalized = jnp.minimum(dist_sq * inv_ss, 25.0)
    attn = jnp.exp(-0.5 * normalized) * amp                        # (M, Kp) f32
    denom = jnp.maximum(jnp.sum(attn, axis=-1, keepdims=True), 1e-8)
    if precise:
        attn = attn / denom
    else:
        attn = attn * pl.reciprocal(denom, approx=True)

    # Value projection: x @ Wv.T, all batch rows folded into M.
    v = lax.dot_general(xm_mm, wv_ref[...],
                        (((1,), (1,)), ((), ())),
                        preferred_element_type=jnp.float32)        # (M, Dp)
    v_mm = v.astype(mm_dtype)
    attn_mm = attn.astype(mm_dtype)

    # Per-batch splat aggregation (splat_reps only couple within a batch).
    # reps = attn.T @ v via LHS-dim-0 contraction (no materialized transpose).
    for b in range(bt):              # bt is a small compile-time constant
        a_b = attn_mm[b * S:(b + 1) * S, :]                        # (S, Kp)
        v_b = v_mm[b * S:(b + 1) * S, :]                           # (S, Dp)
        reps = lax.dot_general(a_b, v_b,
                               (((0,), (0,)), ((), ())),
                               preferred_element_type=jnp.float32)  # (Kp, Dp)
        tok = jnp.dot(a_b, reps.astype(mm_dtype),
                      preferred_element_type=jnp.float32)           # (S, Dp)
        tok_scratch[pl.ds(b * S, S), :] = tok

    # Output projection: tok @ Wo.T, folded over all batch rows from scratch.
    out_full = lax.dot_general(tok_scratch[...].astype(mm_dtype), wo_ref[...],
                               (((1,), (1,)), ((), ())),
                               preferred_element_type=jnp.float32)  # (M, Dp)
    outv = out_full[:, :out_d]                                      # drop D pad
    if mask_ref is not None:
        outv = outv * mask_ref[...].reshape(M, 1)                   # fused mask
    out_ref[...] = outv.reshape(bt, S, out_d).astype(out_ref.dtype)


def splatflow_attention(x, centers, scales, amps, wv, wo,
                        attention_mask=None, *,
                        matmul_dtype=jnp.bfloat16,
                        vmem_limit_bytes=None):
    """Pallas-backed ProductionSplatFlowAttention.forward (eval mode).

    x: (B, S, D); centers: (K, D); scales, amps: (K,); wv, wo: (D, D) in
    PyTorch (out, in) layout; attention_mask: optional (B, S).
    """
    B, S, D = x.shape
    K = centers.shape[0]
    Dp = _round_up(D, 128)                       # lane-dense model dim
    Kp = _round_up(K, 128)                       # lane-dense splat count
    mm_b = jnp.dtype(matmul_dtype).itemsize
    sub = 8 if mm_b >= 4 else (16 if mm_b == 2 else 32)
    Sp = _round_up(S, sub)                       # sublane-pack aligned seq len

    # ---- Host-side padding / precomputation (done once, outside the kernel).
    xp = jnp.pad(x, ((0, 0), (0, Sp - S), (0, Dp - D))).astype(matmul_dtype)
    centers_f32 = jnp.pad(centers.astype(jnp.float32),
                          ((0, Kp - K), (0, Dp - D)))
    c_sq = jnp.sum(centers_f32 * centers_f32, axis=-1)              # (Kp,)
    scales_c = jnp.clip(scales.astype(jnp.float32), 0.1, 3.0)
    inv_ss = jnp.pad(1.0 / (scales_c * scales_c), (0, Kp - K),
                     constant_values=1.0)
    amp = jnp.pad(jnp.clip(amps.astype(jnp.float32), 0.1, 2.0), (0, Kp - K),
                  constant_values=0.0)                              # padded -> 0
    splat_params = jnp.stack([c_sq, inv_ss, amp], axis=0)           # (3, Kp) f32

    wv_mm = jnp.pad(wv, ((0, Dp - D), (0, Dp - D))).astype(matmul_dtype)
    wo_mm = jnp.pad(wo, ((0, Dp - D), (0, Dp - D))).astype(matmul_dtype)

    has_mask = attention_mask is not None
    if has_mask:
        mask_p = jnp.pad(attention_mask.astype(jnp.float32),
                         ((0, 0), (0, Sp - S)))[..., None]          # (B, Sp, 1)

    # ---- Hardware-aware sizing (falls back to v7x numbers if query fails).
    try:
        vmem_cap = int(pltpu.get_tpu_info().vmem_capacity_bytes)
    except Exception:
        vmem_cap = 64 * 1024 * 1024
    target_m = 256 if vmem_cap <= 64 * 1024 * 1024 else 512

    # Batch tiling: fold batch rows into the matmul M dim when S is small, but
    # always keep >= 2 grid steps so both v7x TCs get work and x/out pipeline.
    bt = 1 if Sp >= target_m else min(B, max(1, target_m // Sp))
    bt = min(bt, 8)
    bt = min(bt, max(1, B // 2))
    while B % bt:
        bt -= 1
    M = bt * Sp

    # ---- VMEM budget from the actual footprint.
    out_b = jnp.dtype(x.dtype).itemsize
    blocks = 2 * (bt * Sp * Dp * mm_b + bt * Sp * D * out_b
                  + (bt * Sp * 4 if has_mask else 0))               # dbl-buffered
    resident = Kp * Dp * 4 + 8 * Kp * 4 + 2 * Dp * Dp * mm_b        # consts
    scratch = M * Dp * 4                                            # tok scratch
    interm = (3 * M * Dp * 4 + M * Dp * mm_b + M * Kp * (8 + mm_b)
              + Kp * Dp * (4 + mm_b))                               # temporaries
    if vmem_limit_bytes is None:
        est = int(1.5 * (blocks + resident + scratch + interm))
        cap = max(vmem_cap - 8 * 1024 * 1024, est)
        vmem_limit_bytes = min(max(est, 32 * 1024 * 1024), cap)

    cost = pl.CostEstimate(
        flops=B * Sp * (4 * Dp * Dp + 6 * Kp * Dp),
        transcendentals=B * Sp * Kp,
        bytes_accessed=(B * Sp * Dp * mm_b + B * Sp * D * out_b
                        + (B * Sp * 4 if has_mask else 0)
                        + Kp * Dp * 4 + 3 * Kp * 4 + 2 * Dp * Dp * mm_b))

    in_specs = [
        # x: pipelined per batch tile.
        pl.BlockSpec((bt, Sp, Dp), lambda b: (b, 0, 0)),
        # Constants: whole array resident in VMEM, single-buffered.
        pl.BlockSpec(memory_space=pltpu.MemorySpace.VMEM),          # centers f32
        pl.BlockSpec(memory_space=pltpu.MemorySpace.VMEM),          # splat params
        pl.BlockSpec(memory_space=pltpu.MemorySpace.VMEM),          # Wv
        pl.BlockSpec(memory_space=pltpu.MemorySpace.VMEM),          # Wo
    ]
    inputs = [xp, centers_f32, splat_params, wv_mm, wo_mm]
    if has_mask:
        in_specs.append(pl.BlockSpec((bt, Sp, 1), lambda b: (b, 0, 0)))
        inputs.append(mask_p)

    kernel = functools.partial(_splatflow_kernel, mm_dtype=matmul_dtype,
                               has_mask=has_mask, out_d=D)
    out_p = pl.pallas_call(
        kernel,
        out_shape=jax.ShapeDtypeStruct((B, Sp, D), x.dtype),
        grid=(B // bt,),
        in_specs=in_specs,
        out_specs=pl.BlockSpec((bt, Sp, D), lambda b: (b, 0, 0)),
        scratch_shapes=[pltpu.VMEM((M, Dp), jnp.float32)],
        compiler_params=pltpu.CompilerParams(
            dimension_semantics=("parallel",),
            vmem_limit_bytes=int(vmem_limit_bytes)),
        cost_estimate=cost,
    )(*inputs)

    return out_p[:, :S, :] if Sp != S else out_p


def _reference(x, centers, scales, amps, wv, wo, attention_mask=None):
    """Plain-JAX reference mirroring the PyTorch module (for sanity check)."""
    scales_sq = jnp.clip(scales, 0.1, 3.0) ** 2
    amps_c = jnp.clip(amps, 0.1, 2.0)
    diff = x[:, :, None, :] - centers[None, None, :, :]
    dist_sq = jnp.sum(diff ** 2, axis=-1)
    normalized = jnp.minimum(dist_sq / scales_sq[None, None, :], 25.0)
    attn = jnp.exp(-0.5 * normalized) * amps_c[None, None, :]
    attn = attn / jnp.maximum(attn.sum(-1, keepdims=True), 1e-8)
    v = jnp.einsum('bsd,ed->bse', x, wv)
    reps = jnp.einsum('bsn,bsd->bnd', attn, v)
    tok = jnp.einsum('bsn,bnd->bsd', attn, reps)
    out = jnp.einsum('bsd,ed->bse', tok, wo)
    if attention_mask is not None:
        out = out * attention_mask[..., None]
    return out


if __name__ == "__main__":
    # Small deterministic setup: B=2, S=8, D=32, K=16 splats, layer_idx=0.
    B, S, D, K = 2, 8, 32, 16
    layer_idx = 0

    key = jax.random.PRNGKey(0)
    k_x, k_wv, k_wo, k_c, k_s, k_a, k_m = jax.random.split(key, 7)

    # Module parameter init (deterministic, mirrors __init__):
    std = 0.02 / math.sqrt(layer_idx + 1)
    wv = std * jax.random.normal(k_wv, (D, D), dtype=jnp.float32)   # token_value_proj.weight
    wo = std * jax.random.normal(k_wo, (D, D), dtype=jnp.float32)   # output_proj.weight

    centers = 0.2 * jax.random.normal(k_c, (K, D), dtype=jnp.float32)        # splat positions
    scales = 1.0 + 0.5 * jax.random.uniform(k_s, (K,), dtype=jnp.float32)    # scale in [1, 1.5]
    amps = 1.2 + 0.3 * jax.random.uniform(k_a, (K,), dtype=jnp.float32)      # amplitude in [1.2, 1.5]

    x = jax.random.normal(k_x, (B, S, D), dtype=jnp.float32)
    mask = (jax.random.uniform(k_m, (B, S)) > 0.25).astype(jnp.float32)

    # Optimized (bf16 matmul operands) and full-precision (f32) paths.
    out_bf16 = jax.block_until_ready(
        splatflow_attention(x, centers, scales, amps, wv, wo))
    out_f32 = jax.block_until_ready(
        splatflow_attention(x, centers, scales, amps, wv, wo,
                            matmul_dtype=jnp.float32))
    out_masked = jax.block_until_ready(
        splatflow_attention(x, centers, scales, amps, wv, wo,
                            attention_mask=mask))

    ref = _reference(x, centers, scales, amps, wv, wo)
    ref_masked = _reference(x, centers, scales, amps, wv, wo, mask)

    assert out_bf16.shape == (B, S, D)
    assert out_f32.shape == (B, S, D)
    assert out_masked.shape == (B, S, D)
    assert jnp.allclose(out_f32, ref, atol=2e-4, rtol=1e-2), \
        float(jnp.max(jnp.abs(out_f32 - ref)))
    assert jnp.allclose(out_bf16, ref, atol=3e-3, rtol=5e-2), \
        float(jnp.max(jnp.abs(out_bf16 - ref)))
    assert jnp.allclose(out_masked, ref_masked, atol=3e-3, rtol=5e-2), \
        float(jnp.max(jnp.abs(out_masked - ref_masked)))

    print("KERNEL_OK")
</pallas_src>

<mosaic_0001>
module attributes {stable_mosaic.version = 11 : i64} {
  func.func @_splatflow_kernel(%arg0: i32, %arg1: memref<1x16x128xbf16, #tpu.memory_space<vmem>>, %arg2: memref<128x128xf32, #tpu.memory_space<vmem>>, %arg3: memref<3x128xf32, #tpu.memory_space<vmem>>, %arg4: memref<128x128xbf16, #tpu.memory_space<vmem>>, %arg5: memref<128x128xbf16, #tpu.memory_space<vmem>>, %arg6: memref<1x16x32xf32, #tpu.memory_space<vmem>>, %arg7: memref<16x128xf32, #tpu.memory_space<vmem>>) attributes {dimension_semantics = [#tpu.dimension_semantics<parallel>], iteration_bounds = array<i64: 2>, scalar_prefetch = 0 : i64, scratch_operands = 1 : i64, tpu.core_type = #tpu.core_type<tc>, window_params = [{transform_indices = @transform_0, window_bounds = array<i64: 1, 16, 128>}, {pipeline_mode = #tpu.pipeline_mode<synchronous>, transform_indices = @transform_1, window_bounds = array<i64: 128, 128>}, {pipeline_mode = #tpu.pipeline_mode<synchronous>, transform_indices = @transform_2, window_bounds = array<i64: 3, 128>}, {pipeline_mode = #tpu.pipeline_mode<synchronous>, transform_indices = @transform_3, window_bounds = array<i64: 128, 128>}, {pipeline_mode = #tpu.pipeline_mode<synchronous>, transform_indices = @transform_4, window_bounds = array<i64: 128, 128>}, {transform_indices = @transform_5, window_bounds = array<i64: 1, 16, 32>}]} {
    %c0 = arith.constant 0 : index
    %c0_0 = arith.constant 0 : index
    %c0_1 = arith.constant 0 : index
    %0 = vector.load %arg1[%c0, %c0_0, %c0_1] : memref<1x16x128xbf16, #tpu.memory_space<vmem>>, vector<1x16x128xbf16>
    %1 = vector.shape_cast %0 : vector<1x16x128xbf16> to vector<16x128xbf16>
    %2 = arith.extf %1 : vector<16x128xbf16> to vector<16x128xf32>
    %3 = arith.mulf %2, %2 : vector<16x128xf32>
    %cst = arith.constant dense<0.000000e+00> : vector<16xf32>
    %4 = vector.multi_reduction <add>, %3, %cst [1] : vector<16x128xf32> to vector<16xf32>
    %5 = vector.shape_cast %4 : vector<16xf32> to vector<16x1xf32>
    %c0_2 = arith.constant 0 : index
    %c0_3 = arith.constant 0 : index
    %6 = vector.load %arg2[%c0_2, %c0_3] : memref<128x128xf32, #tpu.memory_space<vmem>>, vector<128x128xf32>
    %cst_4 = arith.constant dense<0.000000e+00> : vector<16x128xf32>
    %7 = tpu.matmul %2, %6, %cst_4 {dimension_numbers = #tpu.dot_dimension_numbers<[1], [1], [0], [0], [0, 0, 1, 0], [], []>} : vector<16x128xf32>, vector<128x128xf32>, vector<16x128xf32> -> vector<16x128xf32>
    %c0_5 = arith.constant 0 : index
    %c0_6 = arith.constant 0 : index
    %8 = vector.load %arg3[%c0_5, %c0_6] : memref<3x128xf32, #tpu.memory_space<vmem>>, vector<1x128xf32>
    %c1 = arith.constant 1 : index
    %c0_7 = arith.constant 0 : index
    %9 = vector.load %arg3[%c1, %c0_7] : memref<3x128xf32, #tpu.memory_space<vmem>>, vector<1x128xf32>
    %c2 = arith.constant 2 : index
    %c0_8 = arith.constant 0 : index
    %10 = vector.load %arg3[%c2, %c0_8] : memref<3x128xf32, #tpu.memory_space<vmem>>, vector<1x128xf32>
    %11 = vector.broadcast %5 : vector<16x1xf32> to vector<16x128xf32>
    %12 = vector.broadcast %8 : vector<1x128xf32> to vector<16x128xf32>
    %13 = arith.addf %11, %12 : vector<16x128xf32>
    %cst_9 = arith.constant 2.000000e+00 : f32
    %14 = vector.broadcast %cst_9 : f32 to vector<16x128xf32>
    %15 = arith.mulf %14, %7 : vector<16x128xf32>
    %16 = arith.subf %13, %15 : vector<16x128xf32>
    %cst_10 = arith.constant 0.000000e+00 : f32
    %17 = vector.broadcast %cst_10 : f32 to vector<16x128xf32>
    %18 = arith.maximumf %16, %17 : vector<16x128xf32>
    %19 = vector.broadcast %9 : vector<1x128xf32> to vector<16x128xf32>
    %20 = arith.mulf %18, %19 : vector<16x128xf32>
    %cst_11 = arith.constant 2.500000e+01 : f32
    %21 = vector.broadcast %cst_11 : f32 to vector<16x128xf32>
    %22 = arith.minimumf %20, %21 : vector<16x128xf32>
    %cst_12 = arith.constant -5.000000e-01 : f32
    %23 = vector.broadcast %cst_12 : f32 to vector<16x128xf32>
    %24 = arith.mulf %23, %22 : vector<16x128xf32>
    %25 = math.exp %24 : vector<16x128xf32>
    %26 = vector.broadcast %10 : vector<1x128xf32> to vector<16x128xf32>
    %27 = arith.mulf %25, %26 : vector<16x128xf32>
    %cst_13 = arith.constant dense<0.000000e+00> : vector<16xf32>
    %28 = vector.multi_reduction <add>, %27, %cst_13 [1] : vector<16x128xf32> to vector<16xf32>
    %29 = vector.shape_cast %28 : vector<16xf32> to vector<16x1xf32>
    %cst_14 = arith.constant 9.99999993E-9 : f32
    %30 = vector.broadcast %cst_14 : f32 to vector<16x1xf32>
    %31 = arith.maximumf %29, %30 : vector<16x1xf32>
    %32 = tpu.reciprocal %31 {approx = true} : vector<16x1xf32> -> vector<16x1xf32>
    %33 = vector.broadcast %32 : vector<16x1xf32> to vector<16x128xf32>
    %34 = arith.mulf %27, %33 : vector<16x128xf32>
    %c0_15 = arith.constant 0 : index
    %c0_16 = arith.constant 0 : index
    %35 = vector.load %arg4[%c0_15, %c0_16] : memref<128x128xbf16, #tpu.memory_space<vmem>>, vector<128x128xbf16>
    %cst_17 = arith.constant dense<0.000000e+00> : vector<16x128xf32>
    %36 = tpu.matmul %1, %35, %cst_17 {dimension_numbers = #tpu.dot_dimension_numbers<[1], [1], [0], [0], [0, 0, 1, 0], [], []>} : vector<16x128xbf16>, vector<128x128xbf16>, vector<16x128xf32> -> vector<16x128xf32>
    %37 = arith.truncf %36 : vector<16x128xf32> to vector<16x128xbf16>
    %38 = arith.truncf %34 : vector<16x128xf32> to vector<16x128xbf16>
    %cst_18 = arith.constant dense<0.000000e+00> : vector<128x128xf32>
    %39 = tpu.matmul %38, %37, %cst_18 {dimension_numbers = #tpu.dot_dimension_numbers<[0], [0], [1], [1], [0, 1, 1, 1], [], []>} : vector<16x128xbf16>, vector<16x128xbf16>, vector<128x128xf32> -> vector<128x128xf32>
    %40 = arith.truncf %39 : vector<128x128xf32> to vector<128x128xbf16>
    %cst_19 = arith.constant dense<0.000000e+00> : vector<16x128xf32>
    %41 = tpu.matmul %38, %40, %cst_19 {dimension_numbers = #tpu.dot_dimension_numbers<[1], [0], [0], [1], [0, 0, 1, 1], [], []>} : vector<16x128xbf16>, vector<128x128xbf16>, vector<16x128xf32> -> vector<16x128xf32>
    %c0_20 = arith.constant 0 : index
    %c0_21 = arith.constant 0 : index
    %42 = vector.load %arg7[%c0_20, %c0_21] : memref<16x128xf32, #tpu.memory_space<vmem>>, vector<16x128xf32>
    tpu.vector_store %arg7[%c0_20, %c0_21], %41 {strides = array<i32>} : memref<16x128xf32, #tpu.memory_space<vmem>>, vector<16x128xf32>,
    %c0_22 = arith.constant 0 : index
    %c0_23 = arith.constant 0 : index
    %43 = vector.load %arg7[%c0_22, %c0_23] : memref<16x128xf32, #tpu.memory_space<vmem>>, vector<16x128xf32>
    %44 = arith.truncf %43 : vector<16x128xf32> to vector<16x128xbf16>
    %c0_24 = arith.constant 0 : index
    %c0_25 = arith.constant 0 : index
    %45 = vector.load %arg5[%c0_24, %c0_25] : memref<128x128xbf16, #tpu.memory_space<vmem>>, vector<128x128xbf16>
    %cst_26 = arith.constant dense<0.000000e+00> : vector<16x128xf32>
    %46 = tpu.matmul %44, %45, %cst_26 {dimension_numbers = #tpu.dot_dimension_numbers<[1], [1], [0], [0], [0, 0, 1, 0], [], []>} : vector<16x128xbf16>, vector<128x128xbf16>, vector<16x128xf32> -> vector<16x128xf32>
    %47 = vector.extract_strided_slice %46 {offsets = [0, 0], sizes = [16, 32], strides = [1, 1]} : vector<16x128xf32> to vector<16x32xf32>
    %48 = vector.shape_cast %47 : vector<16x32xf32> to vector<1x16x32xf32>
    %c0_27 = arith.constant 0 : index
    %c0_28 = arith.constant 0 : index
    %c0_29 = arith.constant 0 : index
    %49 = vector.load %arg6[%c0_27, %c0_28, %c0_29] : memref<1x16x32xf32, #tpu.memory_space<vmem>>, vector<1x16x32xf32>
    tpu.vector_store %arg6[%c0_27, %c0_28, %c0_29], %48 {strides = array<i32>} : memref<1x16x32xf32, #tpu.memory_space<vmem>>, vector<1x16x32xf32>,
    return
  }
  func.func @transform_0(%arg0: i32) -> (i32, i32, i32) {
    %c0_i32 = arith.constant 0 : i32
    %c0_i32_0 = arith.constant 0 : i32
    %c0_i32_1 = arith.constant 0 : i32
    return %arg0, %c0_i32, %c0_i32_0 : i32, i32, i32
  }
  func.func @transform_1(%arg0: i32) -> (i32, i32) {
    %c0_i32 = arith.constant 0 : i32
    %c0_i32_0 = arith.constant 0 : i32
    %c0_i32_1 = arith.constant 0 : i32
    return %c0_i32, %c0_i32_0 : i32, i32
  }
  func.func @transform_2(%arg0: i32) -> (i32, i32) {
    %c0_i32 = arith.constant 0 : i32
    %c0_i32_0 = arith.constant 0 : i32
    %c0_i32_1 = arith.constant 0 : i32
    return %c0_i32, %c0_i32_0 : i32, i32
  }
  func.func @transform_3(%arg0: i32) -> (i32, i32) {
    %c0_i32 = arith.constant 0 : i32
    %c0_i32_0 = arith.constant 0 : i32
    %c0_i32_1 = arith.constant 0 : i32
    return %c0_i32, %c0_i32_0 : i32, i32
  }
  func.func @transform_4(%arg0: i32) -> (i32, i32) {
    %c0_i32 = arith.constant 0 : i32
    %c0_i32_0 = arith.constant 0 : i32
    %c0_i32_1 = arith.constant 0 : i32
    return %c0_i32, %c0_i32_0 : i32, i32
  }
  func.func @transform_5(%arg0: i32) -> (i32, i32, i32) {
    %c0_i32 = arith.constant 0 : i32
    %c0_i32_0 = arith.constant 0 : i32
    %c0_i32_1 = arith.constant 0 : i32
    return %arg0, %c0_i32, %c0_i32_0 : i32, i32, i32
  }
}

</mosaic_0001>

<bundles_post_ra>
// kernel: tpu_custom_call.1
= control target key start
LH: loop header
LB: loop body
LE: loop exit
PB: predicated region body
PF: predicated region fallthrough
CT: control target
= control target key end

     0   :  { %10 = vsyncpa [#allocation4], 0  ;;  %s1879_s0 = inlined_call_operand.hbm [shape: bf16[2,16,128], index: 0, kind: input, shape index: {}]   ;;  %s1880_s1 = inlined_call_operand.hbm [shape: f32[128,128], index: 1, kind: input, shape index: {}]   ;;  %s1881_s2 = inlined_call_operand.vmem [shape: f32[3,128], index: 2, kind: input, shape index: {}]   ;;  %s1882_s3 = inlined_call_operand.hbm [shape: bf16[128,128], index: 3, kind: input, shape index: {}]   ;;  %s1883_s4 = inlined_call_operand.hbm [shape: bf16[128,128], index: 4, kind: input, shape index: {}]   ;;  %s1884_s5 = inlined_call_operand.hbm [shape: f32[2,16,32], index: 5, kind: output, shape index: {}]  }
   0x1   :  { %12 = vsyncpa [#allocation4 + $0x1], 0 }
   0x2   :  { %13 = vsyncpa [#allocation7], 0 }
   0x3   :  { %14 = vsyncpa [#allocation10], 0 }
   0x4   :  { %15 = vsyncpa [#allocation5], 0 }
   0x5   :  { %17 = vsyncpa [#allocation5 + $0x1], 0  ;;  %s1557_s18 = smov 0   ;;  %s1559_s19 = smov 0  }
   0x6   :  { %s1561_s20 = smov 0   ;;  %s1563_s21 = smov 0  }
   0x7 LB: > { %s1578_s22 = sadd.s32 4294967295, %s1512_s21   ;;  %s963_s23 = sadd.s32 4294967294, %s1512_s21   ;;  %s1512_s21 = sphi %s1563_s21, %s1907_s21   ;;  %s1508_s20 = sphi %s1561_s20, %s1906_s20   ;;  %s1504_s19 = sphi %s1559_s19, %s1905_s19   ;;  %s1500_s18 = sphi %s1557_s18, %s1904_s18  }
   0x8   : > { %p43_p0 = scmp.ne.s32.totalorder %s1504_s19, %s1500_s18  ;;  %p1885_p1 = scmp.eq.s32.totalorder %s1578_s22, 0 }
   0x9   : > { %p157_p3 = scmp.eq.s32.totalorder %s963_s23, 1  ;;  %p964_p5 = scmp.ge.s32.totalorder %s1512_s21, 1 }
   0xa   : > { %p1587_p4 = por %p1885_p1, %p43_p0  ;;  %p164_p7 = scmp.lt.s32.totalorder %s1512_s21, 3 }
   0xb   : > { %p1592_p6 = por %p157_p3, %p43_p0  ;;  %s1514_s27 = smov [#allocation6]  }
   0xc   : > { %s1888_s24 = scalar_select %p1587_p4, 1, 0 }
   0xd   : > { %s1889_s25 = scalar_select %p1592_p6, 1, 0 }
   0xe   : > { %p1597_p8 = pnand %p964_p5, %p164_p7  ;;  %s176_s28 = sshll.u32 %s1514_s27, 4  ;;  %s1601_s28 = int_to_ptr.vmem [resolvable:$true] %s176_s28 }
   0xf   : > { %s1515_s30 = smov [#allocation8]   ;;  %s1324_s9 = scalar_lea.hbm %s1880_s1, 2048 }
  0x10   : > { %s1890_s26 = scalar_select %p1597_p8, 1, 0 }
  0x11   : > { %p1228_p9 = pneg %p1597_p8  ;;  %s192_s6 = sshll.u32 %s1515_s30, 4  ;;  %s1612_s6 = int_to_ptr.vmem [resolvable:$true] %s192_s6 }
  0x12   : > { %p1325_p12 = scmp.ne.s32.totalorder %s1880_s1, %s1324_s9  ;;  %p1331_p5 = scmp.lt.u32.totalorder %s1324_s9, %s1880_s1 }
  0x13   : > { %p1608_p11 = pnand %p1228_p9, %p1885_p1 }
  0x15   : > { %p1622_p13 = pneg %p1608_p11 }
  0x17   : > { %p1327_p0 = pnand %p1622_p13, %p1325_p12 }
  0x19   : > { %p1328_p3 = pneg %p1327_p0 }
  0x1b   : > { %p1333_p7 = pnand %p1331_p5, %p1328_p3 }
  0x1d   : > { %1336 = shalt.err (!%p1333_p7)
}
  0x1e   : > { %s1337_s15 = scalar_lea.vmem %s1601_s28, 2048  ;;  %p1345_p2 = scmp.lt.s32.totalorder %s1601_s28, %s1601_s28 }
  0x1f   : > { %p1338_p9 = scmp.ne.s32.totalorder %s1601_s28, %s1337_s15  ;;  %p1346_p6 = scmp.lt.s32.totalorder %s1337_s15, %s1337_s15 }
  0x21   : > { %p1340_p10 = pnand %p1338_p9, %p1622_p13  ;;  %p1347_p12 = por %p1346_p6, %p1345_p2 }
  0x23   : > { %p1341_p1 = pneg %p1340_p10 }
  0x25   : > { %p1348_p0 = pnand %p1347_p12, %p1341_p1 }
  0x27   : > { %1351 = shalt.err (!%p1348_p0)
}
  0x28   : > { %s1516_s16 = smov 128   ;;  %s1517_s17 = smov 8  }
  0x29   : > { %1231 = dma.hbm_to_vmem [thread:$0]  (!%p1608_p11), %s1880_s1, 2048, %s1601_s28, [#allocation7], %s1516_s16, %s1516_s16, %s1517_s17  }
  0x2a   : > { %s1352_s8 = scalar_lea.hbm %s1882_s3, 1024 }
  0x2b   : > { %p1353_p2 = scmp.ne.s32.totalorder %s1882_s3, %s1352_s8  ;;  %p1359_p10 = scmp.lt.u32.totalorder %s1352_s8, %s1882_s3 }
  0x2d   : > { %p1355_p1 = pnand %p1353_p2, %p1622_p13 }
  0x2f   : > { %p1356_p6 = pneg %p1355_p1 }
  0x31   : > { %p1361_p3 = pnand %p1359_p10, %p1356_p6 }
  0x33   : > { %1364 = shalt.err (!%p1361_p3)
}
  0x34   : > { %s1365_s28 = scalar_lea.vmem %s1612_s6, 1024  ;;  %p1373_p12 = scmp.lt.s32.totalorder %s1612_s6, %s1612_s6 }
  0x35   : > { %p1366_p5 = scmp.ne.s32.totalorder %s1612_s6, %s1365_s28  ;;  %p1374_p0 = scmp.lt.s32.totalorder %s1365_s28, %s1365_s28 }
  0x37   : > { %p1368_p7 = pnand %p1366_p5, %p1622_p13  ;;  %p1375_p2 = por %p1374_p0, %p1373_p12 }
  0x39   : > { %p1369_p9 = pneg %p1368_p7 }
  0x3b   : > { %p1376_p1 = pnand %p1375_p2, %p1369_p9 }
  0x3d   : > { %1379 = shalt.err (!%p1376_p1)
}
  0x3e   : > { %s1518_s14 = smov 64   ;;  %s1519_s15 = smov 4  }
  0x3f   : > { %1234 = dma.hbm_to_vmem [thread:$0]  (!%p1608_p11), %s1882_s3, 1024, %s1612_s6, [#allocation7], %s1518_s14, %s1518_s14, %s1519_s15  }
  0x40   : > { %s1520_s23 = smov [#allocation9]   ;;  %s1670_s30 = sadd.s32 1, %s1512_s21  }
  0x41   : > { %s205_s27 = sshll.u32 %s1520_s23, 4  ;;  %s1380_s9 = scalar_lea.hbm %s1883_s4, 1024  ;;  %s206_s27 = int_to_ptr.vmem [resolvable:$true] %s205_s27 }
  0x42   : > { %p1381_p6 = scmp.ne.s32.totalorder %s1883_s4, %s1380_s9  ;;  %p1387_p5 = scmp.lt.u32.totalorder %s1380_s9, %s1883_s4 }
  0x44   : > { %p1383_p10 = pnand %p1381_p6, %p1622_p13 }
  0x46   : > { %p1384_p3 = pneg %p1383_p10 }
  0x48   : > { %p1389_p7 = pnand %p1387_p5, %p1384_p3 }
  0x4a   : > { %1392 = shalt.err (!%p1389_p7)
}
  0x4b   : > { %s1393_s6 = scalar_lea.vmem %s206_s27, 1024  ;;  %p1401_p2 = scmp.lt.s32.totalorder %s206_s27, %s206_s27 }
  0x4c   : > { %p1394_p9 = scmp.ne.s32.totalorder %s206_s27, %s1393_s6  ;;  %p1402_p1 = scmp.lt.s32.totalorder %s1393_s6, %s1393_s6 }
  0x4e   : > { %p1396_p12 = pnand %p1394_p9, %p1622_p13  ;;  %p1403_p4 = por %p1402_p1, %p1401_p2 }
  0x50   : > { %p1397_p0 = pneg %p1396_p12 }
  0x52   : > { %p1404_p8 = pnand %p1403_p4, %p1397_p0 }
  0x54   : > { %1407 = shalt.err (!%p1404_p8)
}
  0x55   : > { %1237 = dma.hbm_to_vmem [thread:$0]  (!%p1608_p11), %s1883_s4, 1024, %s206_s27, [#allocation10], %s1518_s14, %s1518_s14, %s1519_s15  }
  0x56   : > { %s27_s12 = ssub.s32 %s1512_s21, %s1670_s30  ;;  %s30_s29 = sadd.s32 1, %s1508_s20 }
  0x57   : > { %p28_p4 = scmp.eq.s32.totalorder %s27_s12, 0  ;;  %p37_p8 = scmp.ne.s32.totalorder %s1508_s20, %s1504_s19 }
  0x58   : > { %p38_p13 = scmp.eq.s32.totalorder %s1512_s21, 0  ;;  %p1249_p6 = scmp.lt.s32.totalorder %s1512_s21, 2 }
  0x59   : > { %s1701_s23 = scalar_select %p28_p4, %s1508_s20, %s30_s29  }
  0x5a   : > { %p39_p10 = por %p38_p13, %p37_p8  ;;  %p1893_p3 = scmp.eq.s32.totalorder %s1578_s22, 1 }
  0x5b   : > { %s219_s8 = sand.u32 1, %s1508_s20   ;;  %s1011_s9 = sshll.u32 %s1512_s21, 7 }
  0x5c   : > { %p1705_p5 = por %p1893_p3, %p37_p8  ;;  %s969_s10 = sshll.u32 %s219_s8, 3 }
  0x5d   : > { %s1714_s27 = scalar_lea.hbm %s1879_s0, %s1011_s9  ;;  %s223_s28 = scalar_lea.vmem [#allocation3], %s969_s10 }
  0x5e   : > { %s230_s6 = sshll.u32 %s223_s28, 4  ;;  %p1716_p11 = pnand %p1249_p6, %p39_p10  ;;  %s1720_s6 = int_to_ptr.vmem [resolvable:$true] %s230_s6 }
  0x5f   : > { %s1722_s17 = scalar_lea.sflag [#allocation4], %s219_s8  ;;  %s1408_s12 = scalar_lea.hbm %s1714_s27, 128 }
  0x60   : > { %p1409_p7 = scmp.ne.s32.totalorder %s1714_s27, %s1408_s12  ;;  %p1410_p9 = pneg %p1716_p11 }
  0x61   : > { %s1413_s10 = scalar_lea.hbm %s1879_s0, 256  ;;  %p1414_p2 = scmp.lt.u32.totalorder %s1714_s27, %s1879_s0 }
  0x62   : > { %p1411_p12 = pnand %p1410_p9, %p1409_p7  ;;  %p1415_p1 = scmp.lt.u32.totalorder %s1413_s10, %s1408_s12 }
  0x63   : > { %p1417_p8 = scmp.lt.u32.totalorder %s1408_s12, %s1714_s27 }
  0x64   : > { %p1412_p0 = pneg %p1411_p12  ;;  %p1416_p4 = por %p1415_p1, %p1414_p2 }
  0x66   : > { %p1418_p13 = por %p1417_p8, %p1416_p4 }
  0x68   : > { %p1419_p6 = pnand %p1418_p13, %p1412_p0 }
  0x6a   : > { %1422 = shalt.err (!%p1419_p6)
}
  0x6b   : > { %s1423_s8 = scalar_lea.vmem %s1720_s6, 128  ;;  %s1521_s28 = smov [#allocation3]  }
  0x6c   : > { %p1424_p10 = scmp.ne.s32.totalorder %s1720_s6, %s1423_s8  ;;  %s1428_s29 = sshll.u32 %s1521_s28, 4  ;;  %s1429_s29 = int_to_ptr.vmem [resolvable:$false] %s1428_s29 }
  0x6d   : > { %s1430_s9 = scalar_lea.vmem %s1429_s29, 256  ;;  %p1431_p12 = scmp.lt.s32.totalorder %s1720_s6, %s1429_s29 }
  0x6e   : > { %p1426_p3 = pnand %p1424_p10, %p1410_p9  ;;  %p1432_p2 = scmp.lt.s32.totalorder %s1430_s9, %s1423_s8 }
  0x70   : > { %p1427_p7 = pneg %p1426_p3  ;;  %p1433_p1 = por %p1432_p2, %p1431_p12 }
  0x72   : > { %p1434_p4 = pnand %p1433_p1, %p1427_p7 }
  0x74   : > { %1437 = shalt.err (!%p1434_p4)
}
  0x75   : > { %1241 = dma.hbm_to_vmem [thread:$0]  (!%p1716_p11), %s1714_s27, 128, %s1720_s6, %s1722_s17, %s1518_s14, %s1518_s14, %s1519_s15  }
  0x76   : > { %p1896_p9 = scmp.ne.s32.totalorder %s1890_s26, 0 }
  0x77   : > { %s1756_s12 = sand.u32 (!%p1896_p9), 1, %s1504_s19   ;;  %p1897_p0 = scmp.ne.s32.totalorder (!%p1896_p9), %s1888_s24, 0 }
  0x78   : > { %242 = sbr.rel (%p1896_p9) target bundleno = 1404 (0x57c), region = 40  ;;  %s973_s10 = sshll.u32 (!%p1896_p9), %s1756_s12, 3 }
  0x79   : > { %s245_s11 = scalar_lea.sflag (!%p1896_p9), [#allocation4], %s1756_s12  ;;  %s248_s13 = scalar_lea.vmem (!%p1896_p9), [#allocation3], %s973_s10 }
  0x7f   : > { %1483 = dma.done.wait (%p1897_p0), %s245_s11, 128  }
  0x80   : > { %1485 = vsyncadd (%p1897_p0), %s245_s11, 4294967168  ;;  %p1898_p8 = scmp.eq.s32.totalorder %s1578_s22, 0 }
  0x82   : > { %1487 = dma.done.wait (%p1898_p8), [#allocation7], 3072   ;;  %p1899_p11 = pmov %p1898_p8 }
  0x83   : > { %p1900_p13 = pmov %p1898_p8 }
  0x84   : > { %1489 = vsyncadd (%p1899_p11), [#allocation7], 4294964224 }
  0x85   : > { %1491 = dma.done.wait (%p1900_p13), [#allocation10], 1024   ;;  %p1901_p6 = pmov %p1898_p8 }
  0x86   : > { %v298_v0 = vld [vmem:[#allocation6] sm:$0xff]  ;;  %v299_v1 = vld [vmem:[#allocation6 + $0x8] sm:$0xff]  ;;  %v300_v2 = vld [vmem:[#allocation6 + $0x10] sm:$0xff]  ;;  %v1522_v30 = vmov 0.0   ;;  %vm1523_vm0 = vmmov 0   ;;  %vm563_vm1 = vcmask 130048  }
  0x87   : > { %1493 = vsyncadd (%p1901_p6), [#allocation10], 4294966272  ;;  %v1180_v3 = vpack.c.bf16 %v299_v1, %v298_v0  ;;  %v301_v4 = vld [vmem:[#allocation6 + $0x18] sm:$0xff]  ;;  %v302_v6 = vld [vmem:[#allocation6 + $0x20] sm:$0xff]  ;;  %1102 = vmatprep.subr.bf16.mxu1 %v1522_v30  ;;  %1118 = vmatprep.mubr.msk.bf16.mxu1 %vm1523_vm0, %v1522_v30  ;;  %s977_s16 = sshll.u32 %s1756_s12, 4  ;;  %s1012_s28 = sshll.u32 %s1578_s22, 8 }
  0x88   : > { %v1184_v5 = vpack.c.bf16 %v301_v4, %v300_v2  ;;  %v303_v7 = vld [vmem:[#allocation6 + $0x28] sm:$0xff]  ;;  %v1772_v8 = vld [vmem:[%s248_s13] sm:$0xff]   ;;  %v306_v17 = vld [vmem:[#allocation6 + $0x40] sm:$0xff]  ;;  %s286_s17 = scalar_lea.vmem [#allocation11], %s977_s16  ;;  %vm844_vm2 = vcmask 261120   ;;  %s1835_s10 = scalar_lea.hbm %s1884_s5, %s1012_s28 }
  0x89   : > { %1181 = vmatprep.subr.bf16.mxu0 %v1180_v3  ;;  %v290_v9 = vunpack.c.l.bf16 %v1772_v8  ;;  %v291_v10 = vunpack.c.h.bf16 %v1772_v8  ;;  %v1188_v12 = vpack.c.bf16 %v303_v7, %v302_v6  ;;  %v304_v14 = vld [vmem:[#allocation6 + $0x30] sm:$0xff]  ;;  %v305_v15 = vld [vmem:[#allocation6 + $0x38] sm:$0xff]  ;;  %v307_v18 = vld [vmem:[#allocation6 + $0x48] sm:$0xff]  ;;  %s861_s8 = sshll.u32 %s286_s17, 4  ;;  %s848_s11 = scalar_lea.sflag [#allocation5], %s1756_s12  ;;  %s1830_s8 = int_to_ptr.vmem [resolvable:$true] %s861_s8 }
  0x8a   : > { %1183 = vmatpush3.bf16.xpose.msra.mxu0 %v1180_v3  ;;  %v1192_v16 = vpack.c.bf16 %v305_v15, %v304_v14  ;;  %v1196_v19 = vpack.c.bf16 %v307_v18, %v306_v17  ;;  %v308_v20 = vld [vmem:[#allocation6 + $0x50] sm:$0xff]  ;;  %v309_v21 = vld [vmem:[#allocation6 + $0x58] sm:$0xff]  ;;  %v310_v23 = vld [vmem:[#allocation6 + $0x60] sm:$0xff]  ;;  %s1438_s13 = scalar_lea.vmem %s1830_s8, 256  ;;  %s1524_s22 = smov [#allocation11]  }
  0x8b   : > { %1185 = vmatprep.subr.bf16.mxu0 %v1184_v5  ;;  %1099 = vmatprep.mubr.f32.mxu0 %v290_v9  ;;  %v292_v11 = vmul.f32 %v290_v9, %v290_v9  ;;  %v293_v13 = vmul.f32 %v291_v10, %v291_v10  ;;  %v1200_v22 = vpack.c.bf16 %v309_v21, %v308_v20  ;;  %v311_v24 = vld [vmem:[#allocation6 + $0x68] sm:$0xff]  ;;  %v312_v26 = vld [vmem:[#allocation6 + $0x70] sm:$0xff]  ;;  %v313_v27 = vld [vmem:[#allocation6 + $0x78] sm:$0xff]  ;;  %p1439_p10 = scmp.ne.s32.totalorder %s1830_s8, %s1438_s13  ;;  %s1442_s24 = sshll.u32 %s1524_s22, 4  ;;  %s1443_s24 = int_to_ptr.vmem [resolvable:$false] %s1442_s24 }
  0x8c   : > { %v1204_v25 = vpack.c.bf16 %v311_v24, %v310_v23  ;;  %v1208_v28 = vpack.c.bf16 %v313_v27, %v312_v26  ;;  %v1299_v29 = vld [vmem:[#allocation8] sm:$0xff]   ;;  %v1300_v31 = vld [vmem:[#allocation8 + $0x8] sm:$0xff]   ;;  %v1301_v32 = vld [vmem:[#allocation8 + $0x10] sm:$0xff]   ;;  %s1444_s26 = scalar_lea.vmem %s1443_s24, 512  ;;  %p1445_p12 = scmp.lt.s32.totalorder %s1830_s8, %s1443_s24 }
  0x8d   : > { %294 = vadd.xlane.f32.xlu0 %v292_v11  ;;  %1103 = vmatpush3.bf16.xpose.msra.mxu1 %v1299_v29  ;;  %v1302_v33 = vld [vmem:[#allocation8 + $0x18] sm:$0xff]   ;;  %v1303_v34 = vld [vmem:[#allocation8 + $0x20] sm:$0xff]   ;;  %v1304_v35 = vld [vmem:[#allocation8 + $0x28] sm:$0xff]   ;;  %p1440_p3 = pnand %p1439_p10, %p1705_p5  ;;  %p1446_p2 = scmp.lt.s32.totalorder %s1444_s26, %s1438_s13 }
  0x8e   : > { %1104 = vmatprep.subr.bf16.mxu1 %v1522_v30  ;;  %v1305_v36 = vld [vmem:[#allocation8 + $0x30] sm:$0xff]   ;;  %v1306_v37 = vld [vmem:[#allocation8 + $0x38] sm:$0xff]   ;;  %v1307_v23 = vld [vmem:[#allocation9] sm:$0xff]  }
  0x8f   : > { %v978_v39 = vld [vmem:[%s1881_s2] ss:$0 sm:$0xff]  ;;  %v979_v48 = vld [vmem:[%s1881_s2 + $0x1] ss:$0 sm:$0xff]  ;;  %v980_v60 = vld [vmem:[%s1881_s2 + $0x2] ss:$0 sm:$0xff]  ;;  %p1441_p7 = pneg %p1440_p3  ;;  %p1447_p1 = por %p1446_p2, %p1445_p12 }
  0x90   : > { %v1308_v24 = vld [vmem:[#allocation9 + $0x8] sm:$0xff]   ;;  %v1310_v26 = vld [vmem:[#allocation9 + $0x18] sm:$0xff]   ;;  %v1311_v27 = vld [vmem:[#allocation9 + $0x20] sm:$0xff]  }
  0x91   : > { %296 = vadd.xlane.f32.xlu0 %v293_v13  ;;  %v1313_v29 = vld [vmem:[#allocation9 + $0x30] sm:$0xff]   ;;  %p1448_p4 = pnand %p1447_p1, %p1441_p7 }
  0x92   : > { %1187 = vmatpush3.bf16.xpose.msra.mxu0 %v1184_v5 }
  0x93   : > { %1189 = vmatprep.subr.bf16.mxu0 %v1188_v12 }
  0x95   : > { %1105 = vmatpush3.bf16.xpose.msra.mxu1 %v1300_v31  ;;  %v1314_v31 = vld [vmem:[#allocation9 + $0x38] sm:$0xff]  }
  0x96   : > { %1106 = vmatprep.subr.bf16.mxu1 %v1522_v30 }
  0x9a   : > { %1191 = vmatpush3.bf16.xpose.msra.mxu0 %v1188_v12 }
  0x9b   : > { %1193 = vmatprep.subr.bf16.mxu0 %v1192_v16 }
  0x9d   : > { %1107 = vmatpush3.bf16.xpose.msra.mxu1 %v1301_v32 }
  0x9e   : > { %1108 = vmatprep.subr.bf16.mxu1 %v1522_v30 }
  0xa2   : > { %1195 = vmatpush3.bf16.xpose.msra.mxu0 %v1192_v16 }
  0xa3   : > { %1197 = vmatprep.subr.bf16.mxu0 %v1196_v19 }
  0xa5   : > { %1109 = vmatpush3.bf16.xpose.msra.mxu1 %v1302_v33 }
  0xa6   : > { %1110 = vmatprep.subr.bf16.mxu1 %v1522_v30 }
  0xaa   : > { %1199 = vmatpush3.bf16.xpose.msra.mxu0 %v1196_v19 }
  0xab   : > { %1201 = vmatprep.subr.bf16.mxu0 %v1200_v22 }
  0xad   : > { %1111 = vmatpush3.bf16.xpose.msra.mxu1 %v1303_v34 }
  0xae   : > { %1112 = vmatprep.subr.bf16.mxu1 %v1522_v30 }
  0xb2   : > { %1203 = vmatpush3.bf16.xpose.msra.mxu0 %v1200_v22 }
  0xb3   : > { %1205 = vmatprep.subr.bf16.mxu0 %v1204_v25 }
  0xb5   : > { %1113 = vmatpush3.bf16.xpose.msra.mxu1 %v1304_v35 }
  0xb6   : > { %1114 = vmatprep.subr.bf16.mxu1 %v1522_v30 }
  0xba   : > { %1207 = vmatpush3.bf16.xpose.msra.mxu0 %v1204_v25  ;;  %v1309_v25 = vld [vmem:[#allocation9 + $0x10] sm:$0xff]  }
  0xbb   : > { %1209 = vmatprep.subr.bf16.mxu0 %v1208_v28 }
  0xbd   : > { %1115 = vmatpush3.bf16.xpose.msra.mxu1 %v1305_v36 }
  0xbe   : > { %1116 = vmatprep.subr.bf16.mxu1 %v1522_v30 }
  0xc2   : > { %1211 = vmatpush3.bf16.xpose.msra.mxu0 %v1208_v28  ;;  %v1312_v28 = vld [vmem:[#allocation9 + $0x28] sm:$0xff]  }
  0xc3   : > { %1160 = vmatprep.subr.bf16.mxu0 %v1522_v30 }
  0xc5   : > { %1117 = vmatpush3.bf16.xpose.msra.mxu1 %v1306_v37 }
  0xc9   : > { %1100 = vmatmul.mubr.f32.vlgmr.msra.gmra.mrb[0].mxu0 %v291_v10 }
  0xca   : > { %1176 = vmatprep.mubr.msk.bf16.mxu0 %vm1523_vm0, %v1522_v30  ;;  %1161 = vmatpush3.bf16.xpose.msra.mxu0 %v1307_v23 }
  0xcb   : > { %1162 = vmatprep.subr.bf16.mxu0 %v1522_v30 }
  0xcc   : > { %1119 = vmatmul.mubr.bf16.vlgmr.msra.gmra.mrb[0].mxu1 %v1772_v8 }
  0xd2   : > { %1163 = vmatpush3.bf16.xpose.msra.mxu0 %v1308_v24 }
  0xd3   : > { %1164 = vmatprep.subr.bf16.mxu0 %v1522_v30 }
  0xda   : > { %1165 = vmatpush3.bf16.xpose.msra.mxu0 %v1309_v25 }
  0xdb   : > { %1166 = vmatprep.subr.bf16.mxu0 %v1522_v30 }
  0xe2   : > { %1167 = vmatpush3.bf16.xpose.msra.mxu0 %v1310_v26 }
  0xe3   : > { %1168 = vmatprep.subr.bf16.mxu0 %v1522_v30 }
  0xea   : > { %1169 = vmatpush3.bf16.xpose.msra.mxu0 %v1311_v27 }
  0xeb   : > { %1170 = vmatprep.subr.bf16.mxu0 %v1522_v30 }
  0xf2   : > { %1171 = vmatpush3.bf16.xpose.msra.mxu0 %v1312_v28 }
  0xf3   : > { %1172 = vmatprep.subr.bf16.mxu0 %v1522_v30 }
  0xfa   : > { %1173 = vmatpush3.bf16.xpose.msra.mxu0 %v1313_v29 }
  0xfb   : > { %1174 = vmatprep.subr.bf16.mxu0 %v1522_v30 }
 0x102   : > { %1175 = vmatpush3.bf16.xpose.msra.mxu0 %v1314_v31 }
 0x11a   : > { %v295_v38 = vpop.xlane.xlu0 %294 }
 0x11b   : > { %v396_v42 = vadd.f32 %v978_v39, %v295_v38 }
 0x11e   : > { %v297_v40 = vpop.xlane.xlu0 %296 }
 0x11f   : > { %v397_v41 = vadd.f32 %v978_v39, %v297_v40 }
 0x19c   : > { %v1101_v43 = vpop.f32.mrb[0].mxu0 }
 0x19d   : > { %v399_v44 = vmul.f32 2.0, %v1101_v43  ;;  %v380_v45 = vpop.f32.mrb[1].mxu0 }
 0x19e   : > { %v398_v46 = vmul.f32 2.0, %v380_v45 }
 0x19f   : > { %v401_v47 = vsub.f32 %v397_v41, %v399_v44  ;;  %v538_v1 = vpop.f32.mrb[0].mxu1 }
 0x1a0   : > { %v400_v49 = vsub.f32 %v396_v42, %v398_v46  ;;  %v1120_v2 = vpop.f32.mrb[1].mxu1 }
 0x1a1   : > { %v403_v50 = vmax.f32 %v401_v47, 0.0  ;;  %v541_v3 = vpop.f32.mrb[2].mxu1 }
 0x1a2   : > { %v402_v51 = vmax.f32 %v400_v49, 0.0  ;;  %v545_v4 = vpack.c.bf16 %v541_v3, %v538_v1  ;;  %v1121_v5 = vpop.f32.mrb[3].mxu1 }
 0x1a3   : > { %v409_v52 = vmul.f32 %v979_v48, %v403_v50 }
 0x1a4   : > { %v408_v53 = vmul.f32 %v979_v48, %v402_v51  ;;  %1122 = vmatprep.subr.bf16.mxu1 %v545_v4 }
 0x1a5   : > { %v411_v54 = vmin.f32 %v409_v52, 25.0  ;;  %1123 = vmatpush3.bf16.msra.mxu1 %v545_v4 }
 0x1a6   : > { %v410_v55 = vmin.f32 %v408_v53, 25.0  ;;  %1140 = vmatprep.subr.bf16.mxu1 %v1522_v30 }
 0x1a7   : > { %v413_v56 = vmul.f32 -0.5, %v411_v54 }
 0x1a8   : > { %v412_v57 = vmul.f32 -0.5, %v410_v55 }
 0x1a9   : > { %v416_v58 = vmul.f32 1.442695, %v413_v56 }
 0x1aa   : > { %v414_v59 = vmul.f32 1.442695, %v412_v57 }
 0x1ac   : > { %1316 = vpow2.f32 %v414_v59 }
 0x1ad   : > { %1318 = vpow2.f32 %v416_v58 }
 0x1b6   : > { %v1317_v61 = vpop.eup %1316 }
 0x1b7   : > { %v422_v62 = vmul.f32 %v1317_v61, %v980_v60  ;;  %v1319_v63 = vpop.eup %1318 }
 0x1b8   : > { %v423_v0 = vmul.f32 %v1319_v63, %v980_v60 }
 0x1b9   : > { %424 = vadd.xlane.f32.xlu1 %v422_v62 }
 0x1bd   : > { %426 = vadd.xlane.f32.xlu1 %v423_v0 }
 0x246   : > { %v425_v6 = vpop.xlane.xlu1 %424 }
 0x247   : > { %v428_v7 = vmax.f32 %v425_v6, 1e-08 }
 0x249   : > { %1320 = vrcp.f32 %v428_v7 }
 0x24a   : > { %v427_v8 = vpop.xlane.xlu1 %426 }
 0x24b   : > { %v429_v9 = vmax.f32 %v427_v8, 1e-08 }
 0x24d   : > { %1322 = vrcp.f32 %v429_v9 }
 0x253   : > { %v1321_v10 = vpop.eup %1320 }
 0x254   : > { %v432_v12 = vmul.f32 %v1321_v10, %v422_v62 }
 0x257   : > { %v1323_v11 = vpop.eup %1322 }
 0x258   : > { %v433_v13 = vmul.f32 %v1323_v11, %v423_v0 }
 0x25a   : > { %v1800_v14 = vpack.c.bf16 %v433_v13, %v432_v12 }
 0x25c   : > { %547 = vxpose.xlu0.c.b16.start.end [1/1] (short) %v1800_v14, 128 }
 0x2c2   : > { %v555_v15 = vpop.trf.xlu0 }
 0x2c3   : > { %1124 = vmatprep.mubr.msk.bf16.mxu1 %vm563_vm1, %v555_v15 }
 0x2c6   : > { %v556_v16 = vpop.trf.xlu0 }
 0x2c7   : > { %1125 = vmatmul.mubr.msk.bf16.vlgmr.msra.gmra.mrb[4].mxu1 %vm563_vm1, %v556_v16 }
 0x2ca   : > { %v557_v17 = vpop.trf.xlu0 }
 0x2cb   : > { %1128 = vmatprep.mubr.msk.bf16.mxu1 %vm563_vm1, %v557_v17 }
 0x2ce   : > { %v558_v18 = vpop.trf.xlu0 }
 0x2cf   : > { %1129 = vmatmul.mubr.msk.bf16.gmra.mrb[8].mxu1 %vm563_vm1, %v558_v18 }
 0x2d2   : > { %v559_v19 = vpop.trf.xlu0 }
 0x2d3   : > { %1132 = vmatprep.mubr.msk.bf16.mxu1 %vm563_vm1, %v559_v19 }
 0x2d6   : > { %v560_v20 = vpop.trf.xlu0 }
 0x2d7   : > { %1133 = vmatmul.mubr.msk.bf16.gmra.mrb[12].mxu1 %vm563_vm1, %v560_v20 }
 0x2da   : > { %v561_v21 = vpop.trf.xlu0 }
 0x2db   : > { %1136 = vmatprep.mubr.msk.bf16.mxu1 %vm563_vm1, %v561_v21 }
 0x2de   : > { %v562_v22 = vpop.trf.xlu0 }
 0x2df   : > { %1137 = vmatmul.mubr.msk.bf16.gmra.mrb[16].mxu1 %vm563_vm1, %v562_v22 }
 0x2e0   : > { %1156 = vmatprep.mubr.msk.bf16.mxu1 %vm1523_vm0, %v1522_v30 }
 0x39a   : > { %v1126_v32 = vpop.f32.mrb[4].mxu1 }
 0x39b   : > { %v622_v33 = vpop.f32.mrb[5].mxu1 }
 0x39c   : > { %v1127_v34 = vpop.f32.mrb[6].mxu1 }
 0x39d   : > { %v686_v35 = vpack.c.bf16 %v1127_v34, %v1126_v32  ;;  %v625_v36 = vpop.f32.mrb[7].mxu1 }
 0x39e   : > { %v685_v37 = vpack.c.bf16 %v625_v36, %v622_v33 }
 0x3a0   : > { %1141 = vmatpush3.bf16.msra.mxu1 %v685_v37 }
 0x3a1   : > { %1142 = vmatprep.subr.bf16.mxu1 %v1522_v30 }
 0x3a2   : > { %v1130_v38 = vpop.f32.mrb[8].mxu1 }
 0x3a3   : > { %v638_v39 = vpop.f32.mrb[9].mxu1 }
 0x3a4   : > { %v1131_v40 = vpop.f32.mrb[10].mxu1  ;;  %1143 = vmatpush3.bf16.msra.mxu1 %v686_v35 }
 0x3a5   : > { %v688_v41 = vpack.c.bf16 %v1131_v40, %v1130_v38  ;;  %v641_v42 = vpop.f32.mrb[11].mxu1  ;;  %1144 = vmatprep.subr.bf16.mxu1 %v1522_v30 }
 0x3a6   : > { %v687_v43 = vpack.c.bf16 %v641_v42, %v638_v39 }
 0x3a8   : > { %1145 = vmatpush3.bf16.msra.mxu1 %v687_v43 }
 0x3a9   : > { %1146 = vmatprep.subr.bf16.mxu1 %v1522_v30 }
 0x3aa   : > { %v1134_v44 = vpop.f32.mrb[12].mxu1 }
 0x3ab   : > { %v654_v45 = vpop.f32.mrb[13].mxu1 }
 0x3ac   : > { %v1135_v46 = vpop.f32.mrb[14].mxu1  ;;  %1147 = vmatpush3.bf16.msra.mxu1 %v688_v41 }
 0x3ad   : > { %v690_v47 = vpack.c.bf16 %v1135_v46, %v1134_v44  ;;  %v657_v48 = vpop.f32.mrb[15].mxu1  ;;  %1148 = vmatprep.subr.bf16.mxu1 %v1522_v30 }
 0x3ae   : > { %v689_v49 = vpack.c.bf16 %v657_v48, %v654_v45 }
 0x3b0   : > { %1149 = vmatpush3.bf16.msra.mxu1 %v689_v49 }
 0x3b1   : > { %1150 = vmatprep.subr.bf16.mxu1 %v1522_v30 }
 0x3b2   : > { %v1138_v50 = vpop.f32.mrb[16].mxu1 }
 0x3b3   : > { %v670_v51 = vpop.f32.mrb[17].mxu1 }
 0x3b4   : > { %v1139_v52 = vpop.f32.mrb[18].mxu1  ;;  %1151 = vmatpush3.bf16.msra.mxu1 %v690_v47 }
 0x3b5   : > { %v692_v53 = vpack.c.bf16 %v1139_v52, %v1138_v50  ;;  %v673_v54 = vpop.f32.mrb[19].mxu1  ;;  %1152 = vmatprep.subr.bf16.mxu1 %v1522_v30 }
 0x3b6   : > { %v691_v55 = vpack.c.bf16 %v673_v54, %v670_v51 }
 0x3b8   : > { %1153 = vmatpush3.bf16.msra.mxu1 %v691_v55 }
 0x3b9   : > { %1154 = vmatprep.subr.bf16.mxu1 %v1522_v30 }
 0x3bc   : > { %1155 = vmatpush3.bf16.msra.mxu1 %v692_v53 }
 0x3bf   : > { %1157 = vmatmul.mubr.bf16.vlgmr.msra.gmra.mrb[20].mxu1 %v1800_v14 }
 0x492   : > { %v727_v56 = vpop.f32.mrb[20].mxu1 }
 0x493   : > { %v1158_v57 = vpop.f32.mrb[21].mxu1 }
 0x494   : > { %v730_v58 = vpop.f32.mrb[22].mxu1 }
 0x495   : > { %v738_v59 = vpack.c.bf16 %v730_v58, %v727_v56  ;;  %v1159_v60 = vpop.f32.mrb[23].mxu1 }
 0x497   : > { %1177 = vmatmul.mubr.bf16.vlgmr.msra.gmra.mrb[4].mxu0 %v738_v59 }
 0x56a   : > { %v837_v30 = vpop.f32.mrb[4].mxu0 }
 0x56b   : > { %845 = vst.msk [vmem:[%s286_s17] sm:$0xff] %vm844_vm2, %v837_v30  ;;  %v1178_v61 = vpop.f32.mrb[5].mxu0 }
 0x56c   : > { %v840_v62 = vpop.f32.mrb[6].mxu0 }
 0x56d   : > { %846 = vst.msk [vmem:[%s286_s17 + $0x8] sm:$0xff] %vm844_vm2, %v840_v62  ;;  %v1179_v63 = vpop.f32.mrb[7].mxu0 }
 0x56e   : > { %1451 = shalt.err (!%p1448_p4)
}
 0x56f   : > { %s1452_s14 = scalar_lea.hbm %s1835_s10, 256  ;;  %s1456_s6 = scalar_lea.hbm %s1884_s5, 512 }
 0x570   : > { %p1453_p9 = scmp.ne.s32.totalorder %s1835_s10, %s1452_s14  ;;  %p1457_p11 = scmp.lt.u32.totalorder %s1835_s10, %s1884_s5 }
 0x571   : > { %p1458_p13 = scmp.lt.u32.totalorder %s1456_s6, %s1452_s14  ;;  %p1460_p10 = scmp.lt.u32.totalorder %s1452_s14, %s1835_s10 }
 0x572   : > { %p1454_p0 = pnand %p1453_p9, %p1705_p5 }
 0x573   : > { %p1459_p6 = por %p1458_p13, %p1457_p11 }
 0x574   : > { %p1455_p8 = pneg %p1454_p0 }
 0x575   : > { %p1461_p3 = por %p1460_p10, %p1459_p6 }
 0x577   : > { %p1462_p7 = pnand %p1461_p3, %p1455_p8 }
 0x579   : > { %1465 = shalt.err (!%p1462_p7)
}
 0x57a   : > { %s1525_s28 = smov 128   ;;  %s1526_s29 = smov 8  }
 0x57b   : > { %1226 = dma.vmem_to_hbm [thread:$0]  (%p1705_p5), %s1830_s8, 256, %s1835_s10, %s848_s11, %s1525_s28, %s1525_s28, %s1526_s29  }
 0x57c PF: > { %s876_s9 = sand.u32 1, %s1500_s18   ;;  %p1902_p12 = scmp.ne.s32.totalorder %s1889_s25, 0 }
 0x57d   : > { %p1903_p2 = scmp.ge.s32.totalorder %s1512_s21, 2  ;;  %s877_s13 = scalar_lea.sflag [#allocation5], %s876_s9 }
 0x57f   : > { %p1243_p1 = pnand %p1903_p2, %p1902_p12 }
 0x581   : > { %1495 = dma.done.wait (!%p1243_p1), %s877_s13, 256  }
 0x582   : > { %1497 = vsyncadd (!%p1243_p1), %s877_s13, 4294967040  ;;  %p20_p4 = scmp.ge.s32.totalorder %s1670_s30, 4   ;;  %s1904_s18 = smov %s1504_s19 }
 0x583   : > { %s1905_s19 = smov %s1508_s20  ;;  %s1906_s20 = smov %s1701_s23 }
 0x584   : > { %s1907_s21 = smov %s1670_s30  ;;  %22 = sbr.rel (!%p20_p4) target bundleno = 7 (0x7), region = 97 }
 0x58b   :  { %882 = vsyncpa [#allocation4], 1 }
 0x58c   :  { %884 = vsyncpa [#allocation4 + $0x1], 1 }
 0x58d   :  { %885 = vsyncpa [#allocation7], 1 }
 0x58e   :  { %886 = vsyncpa [#allocation10], 1 }
 0x58f   :  { %887 = vsyncpa [#allocation5], 1 }
 0x590   :  { %889 = vsyncpa [#allocation5 + $0x1], 1 }

</bundles_post_ra>
